<compile_context>
chip_gen: v6e
topology: v6e:2x2x1
jax: 0.10.0
libtpu: 0.0.40
codegen_flags: <defaults>
</compile_context>

<pallas_src>
import functools

import jax
import jax.numpy as jnp
from jax import lax
from jax.experimental import pallas as pl
from jax.experimental.pallas import tpu as pltpu


def _round_up(a, b):
    return ((a + b - 1) // b) * b


def _ce_partial_kernel(x_ref, y_ref, out_ref, *, n_valid, tile_n):
    """One batch tile: writes this tile's summed NLL (broadcast) to its own output block.

    x_ref:   (tile_n, C)  logits in the caller's dtype (upcast to f32 in-vreg)
    y_ref:   (tile_n, 1)  i32 target indices
    out_ref: (1, 8, 128)  f32 lane-dense partial-sum block (value replicated)
    """
    i = pl.program_id(0)

    x = x_ref[...].astype(jnp.float32)                         # (tile_n, C)
    y = y_ref[...]                                             # (tile_n, 1)

    # Numerically stable log-sum-exp; target logit gathered from the *shifted*
    # values so the max term cancels: nll = lse - x[tgt] = log(se) - (x[tgt] - m).
    m = jnp.max(x, axis=-1, keepdims=True)                     # (tile_n, 1)
    s = x - m                                                  # (tile_n, C)
    se = jnp.sum(jnp.exp(s), axis=-1, keepdims=True)           # (tile_n, 1)

    cols = lax.broadcasted_iota(jnp.int32, x.shape, 1)         # (tile_n, C)
    tgt_shift = jnp.sum(jnp.where(cols == y, s, 0.0), axis=-1, keepdims=True)

    per_row = jnp.log(se) - tgt_shift                          # (tile_n, 1) per-sample NLL

    # Mask out batch rows beyond N (ragged last tile reads unspecified data; the
    # select discards it even if it is NaN/Inf).
    rows = i * tile_n + lax.broadcasted_iota(jnp.int32, per_row.shape, 0)
    per_row = jnp.where(rows < n_valid, per_row, 0.0)

    partial = jnp.sum(per_row)                                 # scalar: this tile's sum
    # Lane-dense, unmasked full-block store (wrapper reads [:, 0, 0]).
    out_ref[...] = jnp.broadcast_to(partial, out_ref.shape).astype(out_ref.dtype)


def my_loss(x, y, *, tile_n_max=4096, vmem_tile_bytes=8 * 1024 * 1024):
    """Equivalent of My_loss().forward(x, y) == nn.CrossEntropyLoss()(x, y).

    x: (N, C) float logits (f32 or bf16 — kept in the caller's dtype on the wire)
    y: (N,)   integer class indices
    returns scalar float32 mean cross-entropy loss.
    """
    N, C = x.shape
    if not jnp.issubdtype(x.dtype, jnp.floating):
        x = x.astype(jnp.float32)
    y2 = y.astype(jnp.int32).reshape(N, 1)

    itemsize = jnp.dtype(x.dtype).itemsize
    # VMEM stores lane-padded rows even though HBM / the BlockSpec do not.
    c_pad_lanes = _round_up(C, 128)
    bytes_per_row = c_pad_lanes * itemsize

    # Generation-aware VMEM budget (v7x: 64 MiB physical, v5e/v6e: 128 MiB).
    try:
        vmem_cap = int(pltpu.get_tpu_info().vmem_capacity_bytes)
    except Exception:  # interpret mode / unknown chip
        vmem_cap = 64 << 20
    per_buf_budget = min(vmem_tile_bytes, vmem_cap // 8)

    # Batch tile: big enough to amortize the ~0.35 us per-grid-step overhead, small
    # enough to (a) fit the VMEM budget double-buffered and (b) leave >= ~4 grid
    # steps for megacore when N allows.  Multiple of 8 (sublane).
    budget_rows = max(8, per_buf_budget // bytes_per_row)
    mc_rows = max(8, _round_up(pl.cdiv(N, 4), 8))
    tile_n = min(tile_n_max, budget_rows, mc_rows, _round_up(N, 8))
    tile_n = max(8, (tile_n // 8) * 8)

    num_tiles = pl.cdiv(N, tile_n)

    # Explicit scoped-VMEM limit (v5e defaults to only 16 MiB).
    x_block = tile_n * c_pad_lanes * itemsize
    y_block = tile_n * 128 * 4          # (tile_n, 1) i32 lane-pads to 128 in VMEM
    o_block = 8 * 128 * 4
    resident = 2 * (x_block + y_block + o_block)
    vmem_limit = int(min(max(32 << 20, resident + (8 << 20)), int(vmem_cap * 0.75)))

    kernel = functools.partial(_ce_partial_kernel, n_valid=N, tile_n=tile_n)

    out = pl.pallas_call(
        kernel,
        out_shape=jax.ShapeDtypeStruct((num_tiles, 8, 128), jnp.float32),
        grid=(num_tiles,),
        in_specs=[
            pl.BlockSpec((tile_n, C), lambda i: (i, 0)),   # full class dim, no padding
            pl.BlockSpec((tile_n, 1), lambda i: (i, 0)),
        ],
        out_specs=pl.BlockSpec((1, 8, 128), lambda i: (i, 0, 0)),
        compiler_params=pltpu.CompilerParams(
            dimension_semantics=("parallel",),
            vmem_limit_bytes=vmem_limit,
        ),
        cost_estimate=pl.CostEstimate(
            flops=5 * N * C,
            transcendentals=N * C,
            bytes_accessed=N * C * itemsize + N * 4 + num_tiles * 8 * 128 * 4,
        ),
    )(x, y2)

    partials = out[:, 0, 0]            # (num_tiles,) per-tile sums of NLL
    return jnp.sum(partials) / N       # mean reduction in the wrapper


def _reference_ce(x, y):
    # plain-JAX reference for correctness check
    logp = jax.nn.log_softmax(x.astype(jnp.float32), axis=-1)
    nll = -jnp.take_along_axis(logp, y.astype(jnp.int32)[:, None], axis=-1)[:, 0]
    return jnp.mean(nll)


if __name__ == "__main__":
    key = jax.random.PRNGKey(0)
    kx, ky = jax.random.split(key)

    # num_classes=39 from the module's __init__
    N, C = 8, 39
    x = jax.random.normal(kx, (N, C), dtype=jnp.float32)
    y = jax.random.randint(ky, (N,), 0, C, dtype=jnp.int32)

    loss = jax.block_until_ready(my_loss(x, y))
    ref = _reference_ce(x, y)
    assert jnp.allclose(loss, ref, rtol=1e-5, atol=1e-5), (loss, ref)

    # multi-tile / ragged-last-tile path
    N2 = 1000
    kx2, ky2 = jax.random.split(ky)
    x2 = jax.random.normal(kx2, (N2, C), dtype=jnp.float32)
    y2 = jax.random.randint(ky2, (N2,), 0, C, dtype=jnp.int32)
    loss2 = jax.block_until_ready(my_loss(x2, y2))
    ref2 = _reference_ce(x2, y2)
    assert jnp.allclose(loss2, ref2, rtol=1e-5, atol=1e-5), (loss2, ref2)

    # bf16-logits path (no wrapper upcast; kernel upcasts per tile)
    x3 = x2.astype(jnp.bfloat16)
    loss3 = jax.block_until_ready(my_loss(x3, y2))
    ref3 = _reference_ce(x3.astype(jnp.float32), y2)
    assert jnp.allclose(loss3, ref3, rtol=2e-2, atol=2e-2), (loss3, ref3)

    print("KERNEL_OK")
</pallas_src>

<mosaic_0001>
module attributes {stable_mosaic.version = 11 : i64} {
  func.func @_ce_partial_kernel(%arg0: i32, %arg1: memref<8x39xf32, #tpu.memory_space<vmem>>, %arg2: memref<8x1xi32, #tpu.memory_space<vmem>>, %arg3: memref<1x8x128xf32, #tpu.memory_space<vmem>>) attributes {dimension_semantics = [#tpu.dimension_semantics<parallel>], iteration_bounds = array<i64: 1>, scalar_prefetch = 0 : i64, scratch_operands = 0 : i64, tpu.core_type = #tpu.core_type<tc>, window_params = [{transform_indices = @transform_0, window_bounds = array<i64: 8, 39>}, {transform_indices = @transform_1, window_bounds = array<i64: 8, 1>}, {transform_indices = @transform_2, window_bounds = array<i64: 1, 8, 128>}]} {
    %c0 = arith.constant 0 : index
    %c0_0 = arith.constant 0 : index
    %0 = vector.load %arg1[%c0, %c0_0] : memref<8x39xf32, #tpu.memory_space<vmem>>, vector<8x39xf32>
    %c0_1 = arith.constant 0 : index
    %c0_2 = arith.constant 0 : index
    %1 = vector.load %arg2[%c0_1, %c0_2] : memref<8x1xi32, #tpu.memory_space<vmem>>, vector<8x1xi32>
    %cst = arith.constant dense<0xFF800000> : vector<8xf32>
    %2 = vector.multi_reduction <maximumf>, %0, %cst [1] : vector<8x39xf32> to vector<8xf32>
    %3 = vector.shape_cast %2 : vector<8xf32> to vector<8x1xf32>
    %4 = vector.broadcast %3 : vector<8x1xf32> to vector<8x39xf32>
    %5 = arith.subf %0, %4 : vector<8x39xf32>
    %6 = math.exp %5 : vector<8x39xf32>
    %cst_3 = arith.constant dense<0.000000e+00> : vector<8xf32>
    %7 = vector.multi_reduction <add>, %6, %cst_3 [1] : vector<8x39xf32> to vector<8xf32>
    %8 = vector.shape_cast %7 : vector<8xf32> to vector<8x1xf32>
    %9 = tpu.iota {dimensions = array<i32: 1>} : vector<8x39xi32>
    %10 = vector.broadcast %1 : vector<8x1xi32> to vector<8x39xi32>
    %11 = arith.cmpi eq, %9, %10 : vector<8x39xi32>
    %cst_4 = arith.constant 0.000000e+00 : f32
    %12 = vector.broadcast %cst_4 : f32 to vector<8x39xf32>
    %13 = arith.select %11, %5, %12 : vector<8x39xi1>, vector<8x39xf32>
    %cst_5 = arith.constant dense<0.000000e+00> : vector<8xf32>
    %14 = vector.multi_reduction <add>, %13, %cst_5 [1] : vector<8x39xf32> to vector<8xf32>
    %15 = vector.shape_cast %14 : vector<8xf32> to vector<8x1xf32>
    %16 = math.log %8 : vector<8x1xf32>
    %17 = arith.subf %16, %15 : vector<8x1xf32>
    %c8_i32 = arith.constant 8 : i32
    %18 = arith.muli %arg0, %c8_i32 : i32
    %19 = tpu.iota {dimensions = array<i32: 0>} : vector<8x1xi32>
    %20 = vector.broadcast %18 : i32 to vector<8x1xi32>
    %21 = arith.addi %20, %19 : vector<8x1xi32>
    %c8_i32_6 = arith.constant 8 : i32
    %22 = vector.broadcast %c8_i32_6 : i32 to vector<8x1xi32>
    %23 = arith.cmpi slt, %21, %22 : vector<8x1xi32>
    %cst_7 = arith.constant 0.000000e+00 : f32
    %24 = vector.broadcast %cst_7 : f32 to vector<8x1xf32>
    %25 = arith.select %23, %17, %24 : vector<8x1xi1>, vector<8x1xf32>
    %26 = vector.shape_cast %25 : vector<8x1xf32> to vector<1x8x1xf32>
    %cst_8 = arith.constant dense<0.000000e+00> : vector<1xf32>
    %27 = vector.multi_reduction <add>, %26, %cst_8 [1, 2] : vector<1x8x1xf32> to vector<1xf32>
    %28 = vector.shape_cast %27 : vector<1xf32> to vector<1x1x1xf32>
    %29 = vector.extract %28[0, 0, 0] : f32 from vector<1x1x1xf32>
    %30 = vector.broadcast %29 : f32 to vector<1x8x128xf32>
    %c0_9 = arith.constant 0 : index
    %c0_10 = arith.constant 0 : index
    %c0_11 = arith.constant 0 : index
    %31 = vector.load %arg3[%c0_9, %c0_10, %c0_11] : memref<1x8x128xf32, #tpu.memory_space<vmem>>, vector<1x8x128xf32>
    tpu.vector_store %arg3[%c0_9, %c0_10, %c0_11], %30 {strides = array<i32>} : memref<1x8x128xf32, #tpu.memory_space<vmem>>, vector<1x8x128xf32>,
    return
  }
  func.func @transform_0(%arg0: i32) -> (i32, i32) {
    %c0_i32 = arith.constant 0 : i32
    %c0_i32_0 = arith.constant 0 : i32
    return %arg0, %c0_i32 : i32, i32
  }
  func.func @transform_1(%arg0: i32) -> (i32, i32) {
    %c0_i32 = arith.constant 0 : i32
    %c0_i32_0 = arith.constant 0 : i32
    return %arg0, %c0_i32 : i32, i32
  }
  func.func @transform_2(%arg0: i32) -> (i32, i32, i32) {
    %c0_i32 = arith.constant 0 : i32
    %c0_i32_0 = arith.constant 0 : i32
    %c0_i32_1 = arith.constant 0 : i32
    return %arg0, %c0_i32, %c0_i32_0 : i32, i32, i32
  }
}

</mosaic_0001>

<bundles_post_ra>
// kernel: tpu_custom_call.1
= control target key start
LH: loop header
LB: loop body
LE: loop exit
PB: predicated region body
PF: predicated region fallthrough
CT: control target
= control target key end

     0   :  { %vm14_vm0 = vcmask 318464   ;;  %s131_s0 = inlined_call_operand.vmem [shape: f32[8,39], index: 0, kind: input, shape index: {}]   ;;  %s132_s1 = inlined_call_operand.vmem [shape: s32[8,1], index: 1, kind: input, shape index: {}]   ;;  %s133_s2 = inlined_call_operand.hbm [shape: f32[1,8,128], index: 2, kind: output, shape index: {}]  }
   0x1   :  { %v12_v0 = vld [vmem:[%s131_s0] sm:$0xff] }
   0x2   :  { %7 = vsyncpa [#allocation3], 0  ;;  %v15_v1 = vsel %vm14_vm0, %v12_v0, -inf  ;;  %v102_v2 = vmov 0   ;;  %v13_v3 = vld [vmem:[%s132_s1] sm:$0xff]  ;;  %v24_v7 = vlaneseq  ;;  %vm44_vm2 = vcmask 7168  }
   0x3   :  { %75 = vset.pattern.permute.xlu0 %v102_v2  ;;  %s103_s0 = smov [#allocation2]  }
   0x4   :  { %16 = vmax.xlane.f32.xlu0 %v15_v1  ;;  %v25_v8 = vand.u32 127, %v24_v7  ;;  %s63_s1 = sshll.u32 %s103_s0, 4  ;;  %s64_s1 = int_to_ptr.vmem [resolvable:$true] %s63_s1 }
   0x5   :  { %s80_s14 = scalar_lea.vmem %s64_s1, 128  ;;  %p85_p1 = scmp.lt.s32.totalorder %s64_s1, %s64_s1 }
   0x6   :  { %p81_p0 = scmp.ne.s32.totalorder %s64_s1, %s80_s14  ;;  %p86_p2 = scmp.lt.s32.totalorder %s80_s14, %s80_s14 }
   0x8   :  { %p87_p3 = por %p86_p2, %p85_p1 }
   0xa   :  { %p88_p4 = pnand %p87_p3, %p81_p0 }
  0x1a   :  { %27 = vperm.xlu0 %75, %v13_v3  }
  0x8d   :  { %v17_v4 = vpop.xlane.xlu0 %16 }
  0x8e   :  { %v18_v5 = vsub.f32 %v12_v0, %v17_v4 }
  0x90   :  { %v19_v6 = vmul.f32 1.442695, %v18_v5 }
  0x92   :  { %76 = vpow2.f32 %v19_v6 }
  0x95   :  { %v28_v9 = vpop.permute.xlu0 %27 }
  0x96   :  { %vm29_vm1 = vcmp.eq.s32.totalorder %v25_v8, %v28_v9 }
  0x97   :  { %v30_v12 = vsel %vm29_vm1, %v18_v5, 0.0 }
  0x98   :  { %v31_v13 = vsel %vm14_vm0, %v30_v12, 0.0 }
  0x9f   :  { %v77_v10 = vpop.eup %76 }
  0xa0   :  { %v21_v11 = vsel %vm14_vm0, %v77_v10, 0.0 }
  0xa1   :  { %22 = vadd.xlane.f32.xlu1 %v21_v11 }
  0xa5   :  { %32 = vadd.xlane.f32.xlu1 %v31_v13 }
 0x12a   :  { %v23_v14 = vpop.xlane.xlu1 %22 }
 0x12b   :  { %78 = vlog2.f32 %v23_v14 }
 0x12e   :  { %v33_v17 = vpop.xlane.xlu1 %32 }
 0x138   :  { %v79_v15 = vpop.eup %78 }
 0x139   :  { %v35_v16 = vmul.f32 0.6931472, %v79_v15 }
 0x13b   :  { %v36_v18 = vsub.f32 %v35_v16, %v33_v17 }
 0x13d   :  { %v45_v19 = vsel %vm44_vm2, %v36_v18, 0.0 }
 0x13e   :  { %46 = vadd.xlane.f32.xlu1 %v45_v19 }
 0x1c7   :  { %v47_v20 = vpop.xlane.xlu1 %46 }
 0x1c8   :  { %v48_v21 = vrot.slane %v47_v20, 4 }
 0x1ca   :  { %v49_v22 = vadd.f32 %v48_v21, %v47_v20 }
 0x1cc   :  { %v50_v23 = vrot.slane %v49_v22, 2 }
 0x1ce   :  { %v51_v24 = vadd.f32 %v50_v23, %v49_v22 }
 0x1d0   :  { %v52_v25 = vrot.slane %v51_v24, 1 }
 0x1d2   :  { %v53_v26 = vadd.f32 %v52_v25, %v51_v24 }
 0x1d4   :  { %71 = vpush %v53_v26 }
 0x205   :  { %s72_s13 = spop %71 }
 0x206   :  { %v55_v27 = vstv %s72_s13 }
 0x207   :  { %56 = vst [vmem:[#allocation2] sm:$0xff] %v55_v27 }
 0x208   :  { %91 = shalt.err (!%p88_p4)
}
 0x209   :  { %66 = dma.vmem_to_hbm [thread:$0]  %s64_s1, 128, %s133_s2, [#allocation3]  }
 0x20a   :  { %100 = dma.done.wait [#allocation3], 128  }
 0x20b   :  { %101 = vsyncadd [#allocation3], 4294967168 }
 0x20c   :  { %70 = vsyncpa [#allocation3], 1 }

</bundles_post_ra>
